<compile_context>
chip_gen: v7x
topology: tpu7x:2x2x1
jax: 0.10.0
libtpu: 0.0.40
codegen_flags: <defaults>
</compile_context>

<pallas_src>
import math

import jax
import jax.numpy as jnp
from jax.experimental import pallas as pl
from jax.experimental.pallas import tpu as pltpu

_LANE = 128
# Per input block budget (output block is the same size).  With Pallas double
# buffering the working set is ~4x this (=16 MiB), comfortably inside the
# scoped-VMEM limit below on every generation (v5e/v6e 128 MiB, v7x 64 MiB).
_BLOCK_BUDGET_BYTES = 4 * 1024 * 1024
_VMEM_LIMIT_BYTES = 32 * 1024 * 1024


def _round_up(n: int, m: int) -> int:
    return ((n + m - 1) // m) * m


# ---------------------------------------------------------------------------
# Kernel bodies
# ---------------------------------------------------------------------------
def _eca_fused_kernel(x_ref, w_ref, b_ref, out_ref):
    """Pool + k-tap channel conv + sigmoid + scale on a resident (Bt,C,HWp) block.

    x_ref   : VMEM (Bt, C, HWp)   input block (any float dtype), lanes = spatial
    w_ref   : SMEM (k,) f32       Conv1d taps pre-scaled by 1/HW
    b_ref   : SMEM (1,) f32       Conv1d bias
    out_ref : VMEM (Bt, C, HWp)   output block (same dtype as input)
    """
    bt, c, _ = x_ref.shape
    k = w_ref.shape[0]
    pad = (k - 1) // 2

    xb = x_ref[...]
    # AdaptiveAvgPool2d(1): spatial *sum* accumulated in f32 (1/HW lives in taps).
    sums = jnp.sum(xb.astype(jnp.float32), axis=2, keepdims=True)        # (Bt,C,1)

    # Conv1d(1,1,k,padding=pad) across the channel (sublane) axis, in registers:
    # each off-centre tap is a sublane rotate (XLU slot) + iota edge mask.
    cidx = jax.lax.broadcasted_iota(jnp.int32, (bt, c, 1), 1)
    acc = w_ref[pad] * sums                                               # centre tap
    for j in range(k):                                                    # k tiny & static
        if j == pad:
            continue
        rolled = pltpu.roll(sums, shift=(pad - j) % c, axis=1)            # sums[c+j-pad]
        src = cidx + (j - pad)                                            # source channel
        acc = acc + jnp.where((src >= 0) & (src < c), w_ref[j] * rolled, 0.0)

    gate = jax.nn.sigmoid(acc + b_ref[0])                                 # (Bt,C,1) f32
    out_ref[...] = (xb.astype(jnp.float32) * gate).astype(out_ref.dtype)


def _eca_pool_kernel(x_ref, sums_ref):
    """Fallback pass 1: accumulate per-channel spatial sums across HW tiles."""
    @pl.when(pl.program_id(1) == 0)
    def _():
        sums_ref[...] = jnp.zeros_like(sums_ref)
    sums_ref[...] += jnp.sum(x_ref[...].astype(jnp.float32), axis=2, keepdims=True)


def _eca_scale_kernel(x_ref, gate_ref, out_ref):
    """Fallback pass 2: out = x * gate (gate broadcast over the lane axis)."""
    out_ref[...] = (x_ref[...].astype(jnp.float32) * gate_ref[...]).astype(out_ref.dtype)


# ---------------------------------------------------------------------------
# Wrapper
# ---------------------------------------------------------------------------
def eca_pallas(x, conv_w, conv_b, *, block_budget_bytes=_BLOCK_BUDGET_BYTES):
    """ECA-Net forward.  x: (B,C,H,W) float; conv_w: (k,) f32; conv_b: (1,) f32."""
    B, C, H, W = x.shape
    HW = H * W
    k = conv_w.shape[0]
    pad = (k - 1) // 2
    itemsize = x.dtype.itemsize

    # Fold 1/HW into the taps: kernels only need spatial sums, and zero lane
    # padding becomes harmless.
    w_scaled = (conv_w / HW).astype(jnp.float32)
    b_f32 = conv_b.astype(jnp.float32)

    # Lane-dense layout: spatial dims flattened onto lanes.  Small / ragged HW
    # (e.g. the 7x7 FPN level) is zero-padded to a multiple of 128 so stores
    # are unmasked; for big ragged HW the tail mask is cheaper than an extra
    # HBM pad copy, so leave it.
    x_flat = x.reshape(B, C, HW)
    HWp = HW
    if HW % _LANE != 0 and (HW < _LANE or C * HW * itemsize <= 512 * 1024):
        HWp = _round_up(HW, _LANE)
        x_flat = jnp.pad(x_flat, ((0, 0), (0, 0), (0, HWp - HW)))

    cost = pl.CostEstimate(
        flops=3 * B * C * HW + 2 * B * C * k,
        transcendentals=B * C,
        bytes_accessed=2 * B * C * HWp * itemsize,
    )

    # Largest batch-packing factor whose (bt, C, HWp) block fits the budget.
    per_batch_bytes = C * HWp * itemsize
    bt = max((d for d in range(1, B + 1)
              if B % d == 0 and d * per_batch_bytes <= block_budget_bytes),
             default=0)

    if bt > 0:
        # ---- fused single-pass path: block resident in VMEM, x read once and
        # out written once.  (NOTE: for B==1 serving on v7x, pass a smaller
        # block_budget_bytes to route through the tiled path below, whose
        # parallel HW-tile axis feeds the second TensorCore.)
        out_flat = pl.pallas_call(
            _eca_fused_kernel,
            out_shape=jax.ShapeDtypeStruct((B, C, HWp), x.dtype),
            grid=(B // bt,),
            in_specs=[
                pl.BlockSpec((bt, C, HWp), lambda g: (g, 0, 0)),
                pl.BlockSpec(memory_space=pltpu.MemorySpace.SMEM),
                pl.BlockSpec(memory_space=pltpu.MemorySpace.SMEM),
            ],
            out_specs=pl.BlockSpec((bt, C, HWp), lambda g: (g, 0, 0)),
            compiler_params=pltpu.CompilerParams(
                dimension_semantics=("parallel",),
                vmem_limit_bytes=_VMEM_LIMIT_BYTES),
            cost_estimate=cost,
        )(x_flat, w_scaled, b_f32)
    else:
        # ---- two-pass tiled fallback (large C*HW): pool over HW tiles, tiny
        # conv+sigmoid outside the kernels, then a tiled lane-dense scale pass.
        if HWp % _LANE != 0:                      # need equal lane-dense tiles
            HWp = _round_up(HW, _LANE)
            x_flat = jnp.pad(x_flat, ((0, 0), (0, 0), (0, HWp - HW)))
        thw = max((d for d in range(_LANE, HWp + 1, _LANE)
                   if HWp % d == 0 and C * d * itemsize <= block_budget_bytes),
                  default=_LANE)
        n_t = HWp // thw

        sums = pl.pallas_call(
            _eca_pool_kernel,
            out_shape=jax.ShapeDtypeStruct((B, C, 1), jnp.float32),
            grid=(B, n_t),
            in_specs=[pl.BlockSpec((1, C, thw), lambda b, t: (b, 0, t))],
            out_specs=pl.BlockSpec((1, C, 1), lambda b, t: (b, 0, 0)),
            compiler_params=pltpu.CompilerParams(
                dimension_semantics=("parallel", "arbitrary"),
                vmem_limit_bytes=_VMEM_LIMIT_BYTES),
            cost_estimate=pl.CostEstimate(
                flops=B * C * HWp, transcendentals=0,
                bytes_accessed=B * C * HWp * itemsize),
        )(x_flat)

        # k-tap conv + sigmoid on the tiny (B, C) pooled sums; the gate is
        # computed once per batch and reused across all HW tiles.
        y = sums[:, :, 0]
        yp = jnp.pad(y, ((0, 0), (pad, pad)))
        conv = sum(w_scaled[j] * yp[:, j:j + C] for j in range(k)) + b_f32[0]
        gate = jax.nn.sigmoid(conv)[:, :, None]                           # (B,C,1) f32

        out_flat = pl.pallas_call(
            _eca_scale_kernel,
            out_shape=jax.ShapeDtypeStruct((B, C, HWp), x.dtype),
            grid=(B, n_t),
            in_specs=[pl.BlockSpec((1, C, thw), lambda b, t: (b, 0, t)),
                      pl.BlockSpec((1, C, 1), lambda b, t: (b, 0, 0))],
            out_specs=pl.BlockSpec((1, C, thw), lambda b, t: (b, 0, t)),
            compiler_params=pltpu.CompilerParams(
                dimension_semantics=("parallel", "parallel"),
                vmem_limit_bytes=_VMEM_LIMIT_BYTES),
            cost_estimate=cost,
        )(x_flat, gate)

    if HWp != HW:
        out_flat = out_flat[:, :, :HW]
    return out_flat.reshape(B, C, H, W)


# ---------------------------------------------------------------------------
# Pure-JAX reference (mirrors the PyTorch forward exactly)
# ---------------------------------------------------------------------------
def eca_ref(x, conv_w, conv_b):
    B, C, H, W = x.shape
    k = conv_w.shape[0]
    pad = (k - 1) // 2
    y = jnp.mean(x, axis=(2, 3))                      # AdaptiveAvgPool2d(1) -> (B, C)
    y1 = y[:, None, :]                                # squeeze(-1).transpose(-1,-2): (B,1,C)
    conv = jax.lax.conv_general_dilated(
        y1, conv_w.reshape(1, 1, k), (1,), [(pad, pad)],
        dimension_numbers=("NCH", "OIH", "NCH")) + conv_b.reshape(1, 1, 1)
    gate = jax.nn.sigmoid(conv)[:, 0, :]              # (B, C)
    return x * gate[:, :, None, None]


if __name__ == "__main__":
    B, C, H, W = 2, 32, 16, 16
    b_hp, gamma = 1, 2
    ks = int(abs((math.log(C, 2) + b_hp) / gamma))
    ks = ks if ks % 2 else ks + 1                     # C=32 -> kernel_size 3, padding 1

    key = jax.random.PRNGKey(0)
    k0, k1, k2 = jax.random.split(key, 3)
    x = jax.random.normal(k0, (B, C, H, W), jnp.float32)
    conv_w = jax.random.normal(k1, (ks,), jnp.float32) * 0.3   # Conv1d(1,1,ks).weight.view(-1)
    conv_b = jax.random.normal(k2, (1,), jnp.float32) * 0.1    # Conv1d(1,1,ks).bias

    ref = eca_ref(x, conv_w, conv_b)

    # 1) fused single-pass path (whole batch packed into one grid step).
    out = jax.block_until_ready(eca_pallas(x, conv_w, conv_b))
    err = float(jnp.max(jnp.abs(out - ref)))
    assert jnp.allclose(out, ref, atol=1e-4, rtol=1e-4), f"fused path max abs err = {err}"

    # 2) two-pass tiled fallback, forced by shrinking the per-block budget
    #    (exercises the path used for large FPN levels / v7x's 64 MiB VMEM).
    out_t = jax.block_until_ready(
        eca_pallas(x, conv_w, conv_b, block_budget_bytes=16 * 1024))
    err_t = float(jnp.max(jnp.abs(out_t - ref)))
    assert jnp.allclose(out_t, ref, atol=1e-4, rtol=1e-4), f"tiled path max abs err = {err_t}"

    # 3) bf16 I/O (halves HBM traffic; sums/gate stay f32 inside the kernel).
    x_bf16 = x.astype(jnp.bfloat16)
    out_bf16 = jax.block_until_ready(eca_pallas(x_bf16, conv_w, conv_b))
    assert out_bf16.dtype == jnp.bfloat16
    ref_bf16 = eca_ref(x_bf16.astype(jnp.float32), conv_w, conv_b)
    err_b = float(jnp.max(jnp.abs(out_bf16.astype(jnp.float32) - ref_bf16)))
    assert jnp.allclose(out_bf16.astype(jnp.float32), ref_bf16, atol=5e-2, rtol=5e-2), \
        f"bf16 path max abs err = {err_b}"

    print("KERNEL_OK")
</pallas_src>

<mosaic_0001>
module attributes {stable_mosaic.version = 11 : i64} {
  func.func @_eca_fused_kernel(%arg0: i32, %arg1: memref<2x32x256xf32, #tpu.memory_space<vmem>>, %arg2: memref<3xf32, #tpu.memory_space<smem>>, %arg3: memref<1xf32, #tpu.memory_space<smem>>, %arg4: memref<2x32x256xf32, #tpu.memory_space<vmem>>) attributes {dimension_semantics = [#tpu.dimension_semantics<parallel>], iteration_bounds = array<i64: 1>, scalar_prefetch = 0 : i64, scratch_operands = 0 : i64, tpu.core_type = #tpu.core_type<tc>, window_params = [{transform_indices = @transform_0, window_bounds = array<i64: 2, 32, 256>}, {transform_indices = @transform_1, window_bounds = array<i64: 3>}, {transform_indices = @transform_2, window_bounds = array<i64: 1>}, {transform_indices = @transform_3, window_bounds = array<i64: 2, 32, 256>}]} {
    %c0 = arith.constant 0 : index
    %c0_0 = arith.constant 0 : index
    %c0_1 = arith.constant 0 : index
    %0 = vector.load %arg1[%c0, %c0_0, %c0_1] : memref<2x32x256xf32, #tpu.memory_space<vmem>>, vector<2x32x256xf32>
    %cst = arith.constant dense<0.000000e+00> : vector<2x32xf32>
    %1 = vector.multi_reduction <add>, %0, %cst [2] : vector<2x32x256xf32> to vector<2x32xf32>
    %2 = vector.shape_cast %1 : vector<2x32xf32> to vector<2x32x1xf32>
    %3 = tpu.iota {dimensions = array<i32: 1>} : vector<2x32x1xi32>
    %c1 = arith.constant 1 : index
    %4 = memref.load %arg2[%c1] : memref<3xf32, #tpu.memory_space<smem>>
    %5 = vector.broadcast %4 : f32 to vector<2x32x1xf32>
    %6 = arith.mulf %5, %2 : vector<2x32x1xf32>
    %c1_i32 = arith.constant 1 : i32
    %7 = tpu.dynamic_rotate %2 by %c1_i32 dim 1 : vector<2x32x1xf32>, i32 -> vector<2x32x1xf32>
    %c-1_i32 = arith.constant -1 : i32
    %8 = vector.broadcast %c-1_i32 : i32 to vector<2x32x1xi32>
    %9 = arith.addi %3, %8 : vector<2x32x1xi32>
    %c0_i32 = arith.constant 0 : i32
    %10 = vector.broadcast %c0_i32 : i32 to vector<2x32x1xi32>
    %11 = arith.cmpi sge, %9, %10 : vector<2x32x1xi32>
    %c32_i32 = arith.constant 32 : i32
    %12 = vector.broadcast %c32_i32 : i32 to vector<2x32x1xi32>
    %13 = arith.cmpi slt, %9, %12 : vector<2x32x1xi32>
    %14 = arith.andi %11, %13 : vector<2x32x1xi1>
    %c0_2 = arith.constant 0 : index
    %15 = memref.load %arg2[%c0_2] : memref<3xf32, #tpu.memory_space<smem>>
    %16 = vector.broadcast %15 : f32 to vector<2x32x1xf32>
    %17 = arith.mulf %16, %7 : vector<2x32x1xf32>
    %cst_3 = arith.constant 0.000000e+00 : f32
    %18 = vector.broadcast %cst_3 : f32 to vector<2x32x1xf32>
    %19 = arith.select %14, %17, %18 : vector<2x32x1xi1>, vector<2x32x1xf32>
    %20 = arith.addf %6, %19 : vector<2x32x1xf32>
    %c31_i32 = arith.constant 31 : i32
    %21 = tpu.dynamic_rotate %2 by %c31_i32 dim 1 : vector<2x32x1xf32>, i32 -> vector<2x32x1xf32>
    %c1_i32_4 = arith.constant 1 : i32
    %22 = vector.broadcast %c1_i32_4 : i32 to vector<2x32x1xi32>
    %23 = arith.addi %3, %22 : vector<2x32x1xi32>
    %c0_i32_5 = arith.constant 0 : i32
    %24 = vector.broadcast %c0_i32_5 : i32 to vector<2x32x1xi32>
    %25 = arith.cmpi sge, %23, %24 : vector<2x32x1xi32>
    %c32_i32_6 = arith.constant 32 : i32
    %26 = vector.broadcast %c32_i32_6 : i32 to vector<2x32x1xi32>
    %27 = arith.cmpi slt, %23, %26 : vector<2x32x1xi32>
    %28 = arith.andi %25, %27 : vector<2x32x1xi1>
    %c2 = arith.constant 2 : index
    %29 = memref.load %arg2[%c2] : memref<3xf32, #tpu.memory_space<smem>>
    %30 = vector.broadcast %29 : f32 to vector<2x32x1xf32>
    %31 = arith.mulf %30, %21 : vector<2x32x1xf32>
    %cst_7 = arith.constant 0.000000e+00 : f32
    %32 = vector.broadcast %cst_7 : f32 to vector<2x32x1xf32>
    %33 = arith.select %28, %31, %32 : vector<2x32x1xi1>, vector<2x32x1xf32>
    %34 = arith.addf %20, %33 : vector<2x32x1xf32>
    %c0_8 = arith.constant 0 : index
    %35 = memref.load %arg3[%c0_8] : memref<1xf32, #tpu.memory_space<smem>>
    %36 = vector.broadcast %35 : f32 to vector<2x32x1xf32>
    %37 = arith.addf %34, %36 : vector<2x32x1xf32>
    %38 = arith.negf %37 : vector<2x32x1xf32>
    %39 = math.exp %38 : vector<2x32x1xf32>
    %cst_9 = arith.constant 1.000000e+00 : f32
    %40 = vector.broadcast %cst_9 : f32 to vector<2x32x1xf32>
    %41 = arith.addf %40, %39 : vector<2x32x1xf32>
    %42 = arith.divf %40, %41 : vector<2x32x1xf32>
    %43 = vector.broadcast %42 : vector<2x32x1xf32> to vector<2x32x256xf32>
    %44 = arith.mulf %0, %43 : vector<2x32x256xf32>
    %c0_10 = arith.constant 0 : index
    %c0_11 = arith.constant 0 : index
    %c0_12 = arith.constant 0 : index
    %45 = vector.load %arg4[%c0_10, %c0_11, %c0_12] : memref<2x32x256xf32, #tpu.memory_space<vmem>>, vector<2x32x256xf32>
    tpu.vector_store %arg4[%c0_10, %c0_11, %c0_12], %44 {strides = array<i32>} : memref<2x32x256xf32, #tpu.memory_space<vmem>>, vector<2x32x256xf32>,
    return
  }
  func.func @transform_0(%arg0: i32) -> (i32, i32, i32) {
    %c0_i32 = arith.constant 0 : i32
    %c0_i32_0 = arith.constant 0 : i32
    %c0_i32_1 = arith.constant 0 : i32
    return %arg0, %c0_i32, %c0_i32_0 : i32, i32, i32
  }
  func.func @transform_1(%arg0: i32) -> i32 {
    %c0_i32 = arith.constant 0 : i32
    %c0_i32_0 = arith.constant 0 : i32
    return %c0_i32 : i32
  }
  func.func @transform_2(%arg0: i32) -> i32 {
    %c0_i32 = arith.constant 0 : i32
    %c0_i32_0 = arith.constant 0 : i32
    return %c0_i32 : i32
  }
  func.func @transform_3(%arg0: i32) -> (i32, i32, i32) {
    %c0_i32 = arith.constant 0 : i32
    %c0_i32_0 = arith.constant 0 : i32
    %c0_i32_1 = arith.constant 0 : i32
    return %arg0, %c0_i32, %c0_i32_0 : i32, i32, i32
  }
}

</mosaic_0001>

<bundles_post_ra>
// kernel: tpu_custom_call.1
= control target key start
LH: loop header
LB: loop body
LE: loop exit
PB: predicated region body
PF: predicated region fallthrough
CT: control target
= control target key end

     0   :  { %9 = vsyncpa [#allocation4], 0  ;;  %s706_s0 = inlined_call_operand.hbm [shape: f32[2,32,256], index: 0, kind: input, shape index: {}]   ;;  %s707_s1 = inlined_call_operand.vmem [shape: f32[3], index: 1, kind: input, shape index: {}]   ;;  %s708_s2 = inlined_call_operand.<no memory space> [shape: f32[1], index: 2, kind: input, shape index: {}]   ;;  %s709_s3 = inlined_call_operand.hbm [shape: f32[2,32,256], index: 3, kind: output, shape index: {}]  }
   0x1   :  { %10 = vsyncpa [#allocation6], 0 }
   0x2   :  { %11 = vsyncpa [#allocation5], 0  ;;  %s476_s12 = smov [#allocation3]   ;;  %s30_s16 = sshll.u32 %s707_s1, 4  ;;  %s31_s16 = int_to_ptr.vmem [resolvable:$true] %s30_s16 }
   0x3   :  { %s17_s13 = sshll.u32 %s476_s12, 4  ;;  %s414_s19 = scalar_lea.hbm %s706_s0, 2048  ;;  %s18_s13 = int_to_ptr.vmem [resolvable:$true] %s17_s13 }
   0x4   :  { %p415_p0 = scmp.ne.s32.totalorder %s706_s0, %s414_s19  ;;  %p418_p1 = scmp.lt.u32.totalorder %s414_s19, %s706_s0 }
   0x6   :  { %p420_p2 = pnand %p418_p1, %p415_p0 }
   0x8   :  { %423 = shalt.err (!%p420_p2)
}
   0x9   :  { %s424_s24 = scalar_lea.vmem %s18_s13, 2048  ;;  %p429_p4 = scmp.lt.s32.totalorder %s18_s13, %s18_s13 }
   0xa   :  { %p425_p3 = scmp.ne.s32.totalorder %s18_s13, %s424_s24  ;;  %p430_p5 = scmp.lt.s32.totalorder %s424_s24, %s424_s24 }
   0xc   :  { %p431_p6 = por %p430_p5, %p429_p4 }
   0xe   :  { %p432_p7 = pnand %p431_p6, %p425_p3 }
  0x10   :  { %435 = shalt.err (!%p432_p7)
}
  0x11   :  { %s477_s1 = smov 256   ;;  %s478_s25 = smov 16  }
  0x12   :  { %23 = dma.hbm_to_vmem [thread:$0]  %s706_s0, 2048, %s18_s13, [#allocation4], %s477_s1, %s477_s1, %s478_s25  }
  0x13   :  { %s436_s28 = scalar_lea.vmem %s31_s16, 16  ;;  %p441_p9 = scmp.lt.s32.totalorder %s31_s16, %s31_s16 }
  0x14   :  { %p437_p8 = scmp.ne.s32.totalorder %s31_s16, %s436_s28  ;;  %p442_p10 = scmp.lt.s32.totalorder %s436_s28, %s436_s28 }
  0x16   :  { %p443_p11 = por %p442_p10, %p441_p9 }
  0x18   :  { %p444_p12 = pnand %p443_p11, %p437_p8 }
  0x1a   :  { %447 = shalt.err (!%p444_p12)
}
  0x1b   :  { %s479_s29 = smov [#allocation7]  }
  0x1c   :  { %33 = dma.vmem_to_smem %s31_s16, 16, %s479_s29, [#allocation6]  }
  0x1d   :  { %470 = dma.done.wait [#allocation4], 2048  }
  0x1e   :  { %471 = vsyncadd [#allocation4], 4294965248 }
  0x1f   :  { %472 = dma.done.wait [#allocation6], 16  }
  0x20   :  { %473 = vsyncadd [#allocation6], 4294967280 }
  0x21   :  { %42 = sfence }
  0x22   :  { %v520_v0 = vld [vmem:[#allocation3 + $0x40] sm:$0xff]  ;;  %v522_v1 = vld [vmem:[#allocation3 + $0x48] sm:$0xff]  ;;  %v530_v5 = vld [vmem:[#allocation3 + $0x70] sm:$0xff]  ;;  %v480_v24 = vmov 0   ;;  %v83_v25 = vlaneseq  ;;  %s131_s0 = sld [smem:[#allocation7]]  ;;  %s365_s30 = sld [smem:[#allocation7 + $0x2]]  ;;  %v602_v49 = vstv %s708_s2 }
  0x23   :  { %v524_v2 = vld [vmem:[#allocation3] sm:$0xff]  ;;  %v71_v3 = vadd.f32 %v522_v1, %v520_v0  ;;  %v528_v4 = vld [vmem:[#allocation3 + $0x8] sm:$0xff]  ;;  %v532_v6 = vld [vmem:[#allocation3 + $0x78] sm:$0xff]  ;;  %380 = vset.pattern.permute.xlu0 %v480_v24  ;;  %381 = vset.pattern.permute.xlu1 %v480_v24  ;;  %s364_s4 = sld [smem:[#allocation7 + $0x1]]  ;;  %s481_s2 = smov [#allocation8]  }
  0x24   :  { %v59_v7 = vadd.f32 %v528_v4, %v524_v2  ;;  %v536_v8 = vld [vmem:[#allocation3 + $0x30] sm:$0xff]  ;;  %v538_v9 = vld [vmem:[#allocation3 + $0x38] sm:$0xff]  ;;  %v80_v10 = vadd.f32 %v532_v6, %v530_v5  ;;  %v544_v12 = vld [vmem:[#allocation3 + $0x20] sm:$0xff]  ;;  %v568_v26 = vshrl.u32 %v83_v25, 7  ;;  %s351_s7 = sshll.u32 %s481_s2, 4  ;;  %s352_s7 = int_to_ptr.vmem [resolvable:$true] %s351_s7 }
  0x25   :  { %72 = vadd.xlane.f32.xlu1 %v71_v3  ;;  %v68_v11 = vadd.f32 %v538_v9, %v536_v8  ;;  %v546_v13 = vld [vmem:[#allocation3 + $0x28] sm:$0xff]  ;;  %v548_v14 = vld [vmem:[#allocation3 + $0x10] sm:$0xff]  ;;  %v550_v15 = vld [vmem:[#allocation3 + $0x18] sm:$0xff]  ;;  %s448_s8 = scalar_lea.vmem %s352_s7, 2048  ;;  %p453_p0 = scmp.lt.s32.totalorder %s352_s7, %s352_s7 }
  0x26   :  { %60 = vadd.xlane.f32.xlu0 %v59_v7  ;;  %v65_v16 = vadd.f32 %v546_v13, %v544_v12  ;;  %v62_v17 = vadd.f32 %v550_v15, %v548_v14  ;;  %v556_v18 = vld [vmem:[#allocation3 + $0x60] sm:$0xff]  ;;  %v558_v19 = vld [vmem:[#allocation3 + $0x68] sm:$0xff]  ;;  %v560_v20 = vld [vmem:[#allocation3 + $0x50] sm:$0xff]  ;;  %v87_v28 = vadd.s32 24, %v568_v26  ;;  %v115_v30 = vadd.s32 4294967295, %v568_v26  ;;  %p449_p13 = scmp.ne.s32.totalorder %s352_s7, %s448_s8  ;;  %p454_p1 = scmp.lt.s32.totalorder %s448_s8, %s448_s8 }
  0x27   :  { %v562_v21 = vld [vmem:[#allocation3 + $0x58] sm:$0xff]  ;;  %v77_v22 = vadd.f32 %v558_v19, %v556_v18  ;;  %vm106_vm0 = vcmp.lt.s32.totalorder %v568_v26, 1  ;;  %vm165_vm1 = vcmp.lt.s32.totalorder %v568_v26, 7 }
  0x28   :  { %v74_v23 = vadd.f32 %v562_v21, %v560_v20  ;;  %v576_v31 = vadd.s32 1, %v87_v28  ;;  %v581_v34 = vstv %s131_s0  ;;  %v583_v35 = vstv %s365_s30  ;;  %p455_p2 = por %p454_p1, %p453_p0 }
  0x29   :  { %81 = vadd.xlane.f32.xlu1 %v80_v10  ;;  %v586_v42 = vstv %s364_s4  ;;  %vm119_vm2 = vcmp.ge.s32.totalorder %v115_v30, 0 }
  0x2a   :  { %69 = vadd.xlane.f32.xlu0 %v68_v11  ;;  %vm185_vm3 = vcmp.lt.s32.totalorder %v576_v31, 32  ;;  %p456_p3 = pnand %p455_p2, %p449_p13 }
  0x2d   :  { %66 = vadd.xlane.f32.xlu1 %v65_v16 }
  0x2e   :  { %63 = vadd.xlane.f32.xlu0 %v62_v17 }
  0x31   :  { %78 = vadd.xlane.f32.xlu1 %v77_v22 }
  0x32   :  { %75 = vadd.xlane.f32.xlu0 %v74_v23 }
  0xb2   :  { %v570_v27 = vpop.xlane.xlu1 %72 }
  0xb3   :  { %v61_v29 = vpop.xlane.xlu0 %60  ;;  %v99_v33 = vrot.slane %v570_v27, 7  ;;  %v606_v52 = vmul.f32 %v586_v42, %v570_v27 }
  0xb4   :  { %v98_v38 = vrot.slane %v61_v29, 7  ;;  %v157_v39 = vrot.slane %v61_v29, 1  ;;  %v90_v53 = vmul.f32 %v586_v42, %v61_v29 }
  0xb6   :  { %v578_v32 = vpop.xlane.xlu1 %81 }
  0xb7   :  { %v105_v36 = vrot.slane %v578_v32, 7  ;;  %v70_v37 = vpop.xlane.xlu0 %69  ;;  %v164_v54 = vrot.slane %v578_v32, 1 }
  0xb8   :  { %v104_v40 = vrot.slane %v70_v37, 7  ;;  %v163_v41 = vrot.slane %v70_v37, 1  ;;  %v93_v57 = vmul.f32 %v586_v42, %v70_v37 }
  0xb9   :  { %v114_v43 = vsel %vm106_vm0, %v105_v36, %v99_v33 }
  0xba   :  { %v113_v44 = vsel %vm106_vm0, %v104_v40, %v98_v38  ;;  %v172_v45 = vsel %vm165_vm1, %v163_v41, %v157_v39  ;;  %v67_v46 = vpop.xlane.xlu1 %66  ;;  %v137_v56 = vmul.f32 %v581_v34, %v114_v43 }
  0xbb   :  { %v133_v47 = vmul.f32 %v581_v34, %v113_v44  ;;  %v195_v48 = vmul.f32 %v583_v35, %v172_v45  ;;  %v102_v50 = vrot.slane %v67_v46, 7  ;;  %v64_v51 = vpop.xlane.xlu0 %63  ;;  %v161_v55 = vrot.slane %v67_v46, 1 }
  0xbc   :  { %v92_v60 = vmul.f32 %v586_v42, %v67_v46  ;;  %v91_v62 = vmul.f32 %v586_v42, %v64_v51  ;;  %v100_v63 = vrot.slane %v64_v51, 7  ;;  %v159_v16 = vrot.slane %v64_v51, 1 }
  0xbd   :  { %v141_v58 = vsel %vm119_vm2, %v133_v47, 0.0  ;;  %v107_v59 = vsel %vm106_vm0, %v102_v50, %v104_v40  ;;  %v203_v10 = vsel %vm185_vm3, %v195_v48, 0.0  ;;  %v166_v11 = vsel %vm165_vm1, %v161_v55, %v163_v41 }
  0xbe   :  { %v136_v61 = vmul.f32 %v581_v34, %v107_v59  ;;  %v79_v3 = vpop.xlane.xlu1 %78  ;;  %v149_v7 = vadd.f32 %v141_v58, %v90_v53  ;;  %v109_v22 = vsel %vm106_vm0, %v100_v63, %v102_v50  ;;  %v111_v23 = vsel %vm106_vm0, %v98_v38, %v100_v63 }
  0xbf   :  { %v103_v24 = vrot.slane %v79_v3, 7  ;;  %v134_v25 = vmul.f32 %v581_v34, %v111_v23  ;;  %v135_v28 = vmul.f32 %v581_v34, %v109_v22  ;;  %v168_v29 = vsel %vm165_vm1, %v159_v16, %v161_v55  ;;  %v76_v45 = vpop.xlane.xlu0 %75 }
  0xc0   :  { %v152_v17 = vadd.f32 %v136_v61, %v93_v57  ;;  %v170_v37 = vsel %vm165_vm1, %v157_v39, %v159_v16  ;;  %v158_v40 = vrot.slane %v570_v27, 1  ;;  %v162_v44 = vrot.slane %v79_v3, 1 }
  0xc1   :  { %v192_v43 = vmul.f32 %v583_v35, %v170_v37  ;;  %v194_v38 = vmul.f32 %v583_v35, %v166_v11  ;;  %v150_v46 = vadd.f32 %v134_v25, %v91_v62  ;;  %v151_v47 = vadd.f32 %v135_v28, %v92_v60 }
  0xc2   :  { %v211_v41 = vadd.f32 %v203_v10, %v152_v17  ;;  %v193_v48 = vmul.f32 %v583_v35, %v168_v29  ;;  %v145_v50 = vsel %vm119_vm2, %v137_v56, 0.0  ;;  %v173_v51 = vsel %vm165_vm1, %v164_v54, %v158_v40 }
  0xc3   :  { %v208_v53 = vadd.f32 %v192_v43, %v149_v7  ;;  %v96_v39 = vmul.f32 %v586_v42, %v79_v3  ;;  %v210_v57 = vadd.f32 %v194_v38, %v151_v47  ;;  %v108_v58 = vsel %vm106_vm0, %v103_v24, %v105_v36 }
  0xc4   :  { %v209_v55 = vadd.f32 %v193_v48, %v150_v46  ;;  %v101_v59 = vrot.slane %v76_v45, 7  ;;  %v221_v61 = vadd.f32 %v602_v49, %v211_v41  ;;  %v167_v30 = vsel %vm165_vm1, %v162_v44, %v164_v54 }
  0xc5   :  { %v218_v60 = vadd.f32 %v602_v49, %v208_v53  ;;  %v160_v56 = vrot.slane %v76_v45, 1  ;;  %v220_v63 = vadd.f32 %v602_v49, %v210_v57  ;;  %v95_v3 = vmul.f32 %v586_v42, %v76_v45 }
  0xc6   :  { %v219_v62 = vadd.f32 %v602_v49, %v209_v55  ;;  %v110_v7 = vsel %vm106_vm0, %v101_v59, %v103_v24  ;;  %v140_v36 = vmul.f32 %v581_v34, %v108_v58  ;;  %v112_v11 = vsel %vm106_vm0, %v99_v33, %v101_v59 }
  0xc7   :  { %v366_v10 = vmul.f32 -1.442695, %v218_v60  ;;  %v139_v54 = vmul.f32 %v581_v34, %v110_v7  ;;  %v368_v17 = vmul.f32 -1.442695, %v220_v63  ;;  %v198_v22 = vmul.f32 %v583_v35, %v167_v30 }
  0xc8   :  { %v367_v16 = vmul.f32 -1.442695, %v219_v62  ;;  %v138_v23 = vmul.f32 %v581_v34, %v112_v11  ;;  %v169_v24 = vsel %vm165_vm1, %v160_v56, %v162_v44  ;;  %v171_v28 = vsel %vm165_vm1, %v158_v40, %v160_v56 }
  0xc9   :  { %382 = vpow2.f32 %v366_v10  ;;  %v155_v25 = vadd.f32 %v139_v54, %v96_v39  ;;  %v369_v27 = vmul.f32 -1.442695, %v221_v61  ;;  %v196_v33 = vmul.f32 %v583_v35, %v171_v28 }
  0xca   :  { %384 = vpow2.f32 %v367_v16  ;;  %v154_v29 = vadd.f32 %v138_v23, %v95_v3  ;;  %v197_v37 = vmul.f32 %v583_v35, %v169_v24  ;;  %v97_v34 = vmul.f32 %v586_v42, %v578_v32 }
  0xcb   :  { %386 = vpow2.f32 %v368_v17  ;;  %v214_v41 = vadd.f32 %v198_v22, %v155_v25  ;;  %v153_v43 = vadd.f32 %v145_v50, %v606_v52  ;;  %v199_v45 = vmul.f32 %v583_v35, %v173_v51 }
  0xcc   :  { %v213_v44 = vadd.f32 %v197_v37, %v154_v29  ;;  %388 = vpow2.f32 %v369_v27  ;;  %v156_v40 = vadd.f32 %v140_v36, %v97_v34 }
  0xcd   :  { %v224_v26 = vadd.f32 %v602_v49, %v214_v41  ;;  %v212_v38 = vadd.f32 %v196_v33, %v153_v43  ;;  %v207_v47 = vsel %vm185_vm3, %v199_v45, 0.0 }
  0xce   :  { %v223_v46 = vadd.f32 %v602_v49, %v213_v44  ;;  %v215_v39 = vadd.f32 %v207_v47, %v156_v40 }
  0xcf   :  { %v372_v53 = vmul.f32 -1.442695, %v224_v26  ;;  %v222_v32 = vadd.f32 %v602_v49, %v212_v38 }
  0xd0   :  { %v371_v48 = vmul.f32 -1.442695, %v223_v46  ;;  %v225_v55 = vadd.f32 %v602_v49, %v215_v39 }
  0xd1   :  { %v370_v57 = vmul.f32 -1.442695, %v222_v32 }
  0xd2   :  { %390 = vpow2.f32 %v371_v48  ;;  %v373_v59 = vmul.f32 -1.442695, %v225_v55 }
  0xd3   :  { %v383_v42 = vpop.eup %382  ;;  %392 = vpow2.f32 %v372_v53 }
  0xd4   :  { %v385_v52 = vpop.eup %384  ;;  %v250_v35 = vadd.f32 1.0, %v383_v42 }
  0xd5   :  { %v387_v50 = vpop.eup %386  ;;  %v251_v51 = vadd.f32 1.0, %v385_v52 }
  0xd6   :  { %394 = vrcp.f32 %v250_v35  ;;  %v252_v58 = vadd.f32 1.0, %v387_v50  ;;  %v389_v31 = vpop.eup %388 }
  0xd7   :  { %396 = vrcp.f32 %v251_v51  ;;  %v253_v61 = vadd.f32 1.0, %v389_v31 }
  0xd8   :  { %398 = vpow2.f32 %v370_v57 }
  0xd9   :  { %400 = vrcp.f32 %v252_v58 }
  0xda   :  { %402 = vpow2.f32 %v373_v59 }
  0xdb   :  { %404 = vrcp.f32 %v253_v61 }
  0xdc   :  { %v391_v60 = vpop.eup %390 }
  0xdd   :  { %v393_v30 = vpop.eup %392  ;;  %v255_v56 = vadd.f32 1.0, %v391_v60 }
  0xde   :  { %v256_v3 = vadd.f32 1.0, %v393_v30 }
  0xdf   :  { %406 = vrcp.f32 %v255_v56 }
  0xe0   :  { %v395_v62 = vpop.eup %394  ;;  %408 = vrcp.f32 %v256_v3 }
  0xe1   :  { %v397_v63 = vpop.eup %396  ;;  %276 = vperm.xlu0 %380, %v395_v62  }
  0xe2   :  { %281 = vperm.xlu1 %381, %v397_v63   ;;  %v399_v49 = vpop.eup %398 }
  0xe3   :  { %v401_v7 = vpop.eup %400  ;;  %v254_v10 = vadd.f32 1.0, %v399_v49 }
  0xe4   :  { %v403_v36 = vpop.eup %402 }
  0xe5   :  { %v405_v11 = vpop.eup %404  ;;  %v257_v54 = vadd.f32 1.0, %v403_v36  ;;  %410 = vrcp.f32 %v254_v10 }
  0xe6   :  { %286 = vperm.xlu1 %381, %v401_v7  }
  0xe7   :  { %412 = vrcp.f32 %v257_v54 }
  0xe9   :  { %v407_v16 = vpop.eup %406 }
  0xea   :  { %291 = vperm.xlu1 %381, %v405_v11   ;;  %v409_v17 = vpop.eup %408 }
  0xee   :  { %301 = vperm.xlu1 %381, %v407_v16  }
  0xef   :  { %v411_v22 = vpop.eup %410 }
  0xf1   :  { %v413_v23 = vpop.eup %412 }
  0xf2   :  { %306 = vperm.xlu1 %381, %v409_v17  }
  0xf6   :  { %296 = vperm.xlu1 %381, %v411_v22  }
  0xfa   :  { %311 = vperm.xlu1 %381, %v413_v23  }
 0x160   :  { %v277_v25 = vpop.permute.xlu0 %276 }
 0x161   :  { %v314_v24 = vmul.f32 %v277_v25, %v524_v2  ;;  %v315_v28 = vmul.f32 %v277_v25, %v528_v4  ;;  %v282_v27 = vpop.permute.xlu1 %281 }
 0x162   :  { %v316_v29 = vmul.f32 %v282_v27, %v548_v14  ;;  %v317_v33 = vmul.f32 %v282_v27, %v550_v15 }
 0x163   :  { %330 = vst [vmem:[#allocation8] sm:$0xff] %v314_v24  ;;  %331 = vst [vmem:[#allocation8 + $0x8] sm:$0xff] %v315_v28 }
 0x164   :  { %332 = vst [vmem:[#allocation8 + $0x10] sm:$0xff] %v316_v29  ;;  %333 = vst [vmem:[#allocation8 + $0x18] sm:$0xff] %v317_v33 }
 0x165   :  { %v287_v37 = vpop.permute.xlu1 %286 }
 0x166   :  { %v318_v41 = vmul.f32 %v287_v37, %v544_v12  ;;  %v319_v34 = vmul.f32 %v287_v37, %v546_v13 }
 0x168   :  { %334 = vst [vmem:[#allocation8 + $0x20] sm:$0xff] %v318_v41  ;;  %335 = vst [vmem:[#allocation8 + $0x28] sm:$0xff] %v319_v34 }
 0x169   :  { %v292_v43 = vpop.permute.xlu1 %291 }
 0x16a   :  { %v320_v2 = vmul.f32 %v292_v43, %v536_v8  ;;  %v321_v4 = vmul.f32 %v292_v43, %v538_v9 }
 0x16c   :  { %336 = vst [vmem:[#allocation8 + $0x30] sm:$0xff] %v320_v2  ;;  %337 = vst [vmem:[#allocation8 + $0x38] sm:$0xff] %v321_v4 }
 0x16d   :  { %v302_v14 = vpop.permute.xlu1 %301 }
 0x16e   :  { %v324_v15 = vmul.f32 %v302_v14, %v560_v20  ;;  %v325_v45 = vmul.f32 %v302_v14, %v562_v21 }
 0x170   :  { %340 = vst [vmem:[#allocation8 + $0x50] sm:$0xff] %v324_v15  ;;  %341 = vst [vmem:[#allocation8 + $0x58] sm:$0xff] %v325_v45 }
 0x171   :  { %v307_v44 = vpop.permute.xlu1 %306 }
 0x172   :  { %v326_v12 = vmul.f32 %v307_v44, %v556_v18  ;;  %v327_v13 = vmul.f32 %v307_v44, %v558_v19 }
 0x174   :  { %342 = vst [vmem:[#allocation8 + $0x60] sm:$0xff] %v326_v12  ;;  %343 = vst [vmem:[#allocation8 + $0x68] sm:$0xff] %v327_v13 }
 0x175   :  { %v297_v26 = vpop.permute.xlu1 %296 }
 0x176   :  { %v322_v8 = vmul.f32 %v297_v26, %v520_v0  ;;  %v323_v9 = vmul.f32 %v297_v26, %v522_v1 }
 0x178   :  { %338 = vst [vmem:[#allocation8 + $0x40] sm:$0xff] %v322_v8  ;;  %339 = vst [vmem:[#allocation8 + $0x48] sm:$0xff] %v323_v9 }
 0x179   :  { %v312_v20 = vpop.permute.xlu1 %311 }
 0x17a   :  { %v328_v21 = vmul.f32 %v312_v20, %v530_v5  ;;  %v329_v40 = vmul.f32 %v312_v20, %v532_v6 }
 0x17c   :  { %344 = vst [vmem:[#allocation8 + $0x70] sm:$0xff] %v328_v21  ;;  %345 = vst [vmem:[#allocation8 + $0x78] sm:$0xff] %v329_v40 }
 0x17d   :  { %459 = shalt.err (!%p456_p3)
}
 0x17e   :  { %s460_s11 = scalar_lea.hbm %s709_s3, 2048 }
 0x17f   :  { %p461_p4 = scmp.ne.s32.totalorder %s709_s3, %s460_s11  ;;  %p464_p5 = scmp.lt.u32.totalorder %s460_s11, %s709_s3 }
 0x181   :  { %p466_p6 = pnand %p464_p5, %p461_p4 }
 0x183   :  { %469 = shalt.err (!%p466_p6)
}
 0x184   :  { %357 = dma.vmem_to_hbm [thread:$0]  %s352_s7, 2048, %s709_s3, [#allocation5], %s477_s1, %s477_s1, %s478_s25  }
 0x185   :  { %474 = dma.done.wait [#allocation5], 2048  }
 0x186   :  { %475 = vsyncadd [#allocation5], 4294965248 }
 0x187   :  { %361 = vsyncpa [#allocation4], 1 }
 0x188   :  { %362 = vsyncpa [#allocation5], 1 }
 0x189   :  { %363 = vsyncpa [#allocation6], 1 }

</bundles_post_ra>
